<compile_context>
chip_gen: v6e
topology: v6e:2x2x1
jax: 0.10.0
libtpu: 0.0.40
codegen_flags: <defaults>
</compile_context>

<pallas_src>
import functools

import jax
import jax.numpy as jnp
from jax.experimental import pallas as pl
from jax.experimental.pallas import tpu as pltpu


def _round_up(x, m):
    return (x + m - 1) // m * m


def _leaky_relu(x, alpha):
    return jnp.where(x > 0, x, alpha * x)


def ae_kernel(x_ref,
              w1_ref, b1_ref,
              w2_ref, b2_ref,
              w3_ref, b3_ref,
              w4_ref, b4_ref,
              out_ref,
              *, alpha, pad_w):
    # x arrives f32; cast to bf16 in-kernel (VPU filler under the matmuls).
    x = x_ref[...].astype(jnp.bfloat16)

    # enc_1 + LeakyReLU  (bf16 MXU operands, f32 accumulation).
    h1 = jnp.dot(x, w1_ref[...], preferred_element_type=jnp.float32) + b1_ref[...]
    h1 = _leaky_relu(h1, alpha)

    # enc_2 (no activation)
    z = jnp.dot(h1.astype(jnp.bfloat16), w2_ref[...],
                preferred_element_type=jnp.float32) + b2_ref[...]

    # dec_1 + LeakyReLU
    d1 = jnp.dot(z.astype(jnp.bfloat16), w3_ref[...],
                 preferred_element_type=jnp.float32) + b3_ref[...]
    d1 = _leaky_relu(d1, alpha)

    # dec_2 (no activation)
    xbar = jnp.dot(d1.astype(jnp.bfloat16), w4_ref[...],
                   preferred_element_type=jnp.float32) + b4_ref[...]

    # Pack [ae_z | ae_x_bar | enc_h1 | zeros] into one lane-dense slab:
    # a single full-lane unmasked store, minimal HBM writeback.
    parts = [z, xbar, h1]
    if pad_w:
        parts.append(jnp.zeros((z.shape[0], pad_w), jnp.float32))
    out_ref[...] = jnp.concatenate(parts, axis=-1).astype(out_ref.dtype)


def _vmem_capacity_bytes():
    """Per-core VMEM capacity; conservative fallback (v7x = 64 MiB)."""
    try:
        info = pltpu.get_tpu_info()
        cap = getattr(info, "vmem_capacity_bytes", None)
        if cap:
            return int(cap)
    except Exception:
        pass
    return 64 * 1024 * 1024


def _pick_batch_tile(B, F, H, E, Wp, budget_bytes, max_tb):
    """Largest batch tile (multiple of 8, <= max_tb) whose VMEM footprint fits.

    Counts Pallas double-buffering of *all* blocks (including constant-index_map
    'resident' weights/biases) and the in-kernel f32 intermediates.
    """
    if B <= 8:
        return B
    # Resident weights (bf16) + biases (f32); x2 for Pallas double-buffering.
    resident = 2 * (2 * (F * H + H * E + E * H + H * F) + 4 * (2 * H + E + F))
    tb = _round_up(min(max_tb, B), 8)
    while tb > 8:
        streamed = 2 * tb * (4 * F + 4 * Wp)                   # x tile + out slab, x2 buffers
        interm = tb * (4 * (2 * H + E + F + Wp)                # f32 h1, z, d1, xbar + slab
                       + 2 * (F + 2 * H + E))                  # bf16 casts
        if resident + streamed + interm <= budget_bytes:
            break
        tb = _round_up(tb // 2, 8)
    tb = max(tb, 8)
    # Prefer a tile that divides B exactly (avoids a partial trailing block).
    if B % tb:
        for d in range(tb, 7, -8):
            if B % d == 0:
                return d
    return tb


def ae_forward(x, params, *, alpha=0.2, block_b=1024):
    """AE forward pass as a single fused Pallas kernel, gridded over batch.

    x: [B, F] float32
    params: dict with w1 [F,H], b1 [H], w2 [H,E], b2 [E],
                      w3 [E,H], b3 [H], w4 [H,F], b4 [F]
            (weights stored as [in, out], i.e. transpose of PyTorch Linear.weight)
    returns (ae_z [B,E], ae_x_bar [B,F], enc_h1 [B,H])  -- all float32
    """
    B, F = x.shape
    H = params["w1"].shape[1]
    E = params["w2"].shape[1]

    # Packed output slab: [ae_z | ae_x_bar | enc_h1 | pad] -> lane-dense width.
    W = E + F + H
    Wp = _round_up(W, 128)
    pad_w = Wp - W

    # Generation-aware VMEM sizing: ~48 MiB on v7x, ~96 MiB on v5e/v6e.
    vmem_limit = min(int(_vmem_capacity_bytes() * 0.75), 100 * 1024 * 1024)
    tile_budget = int(vmem_limit * 0.80)

    # Cap TB so the grid has >=2 (ideally 4+) steps -> megacore on v7x.
    cap2 = _round_up(-(-B // 2), 8)
    cap4 = _round_up(-(-B // 4), 8)
    max_tb = cap4 if cap4 >= 256 else cap2
    max_tb = max(8, min(block_b, max_tb))

    TB = _pick_batch_tile(B, F, H, E, Wp, tile_budget, max_tb)
    grid = (pl.cdiv(B, TB),)

    w1 = params["w1"].astype(jnp.bfloat16)
    w2 = params["w2"].astype(jnp.bfloat16)
    w3 = params["w3"].astype(jnp.bfloat16)
    w4 = params["w4"].astype(jnp.bfloat16)
    b1 = params["b1"].reshape(1, H).astype(jnp.float32)
    b2 = params["b2"].reshape(1, E).astype(jnp.float32)
    b3 = params["b3"].reshape(1, H).astype(jnp.float32)
    b4 = params["b4"].reshape(1, F).astype(jnp.float32)

    tiled = lambda shape: pl.BlockSpec(shape, lambda i: (i, 0))      # per-batch-tile
    resident = lambda shape: pl.BlockSpec(shape, lambda i: (0, 0))   # stays in VMEM

    flops = 2 * B * (F * H + H * E + E * H + H * F)
    bytes_accessed = (
        B * F * 4                                              # x (f32)
        + 2 * (F * H + H * E + E * H + H * F)                  # weights (bf16)
        + 4 * (2 * H + E + F)                                  # biases (f32)
        + 4 * B * Wp                                           # packed output slab (f32)
    )

    kernel = functools.partial(ae_kernel, alpha=alpha, pad_w=pad_w)

    out = pl.pallas_call(
        kernel,
        out_shape=jax.ShapeDtypeStruct((B, Wp), jnp.float32),
        grid=grid,
        in_specs=[
            tiled((TB, F)),
            resident((F, H)), resident((1, H)),
            resident((H, E)), resident((1, E)),
            resident((E, H)), resident((1, H)),
            resident((H, F)), resident((1, F)),
        ],
        out_specs=tiled((TB, Wp)),
        compiler_params=pltpu.CompilerParams(
            dimension_semantics=("parallel",),        # megacore on v7x
            vmem_limit_bytes=vmem_limit,
        ),
        cost_estimate=pl.CostEstimate(
            flops=flops, transcendentals=0, bytes_accessed=bytes_accessed),
    )(x.astype(jnp.float32), w1, b1, w2, b2, w3, b3, w4, b4)

    # Slice the packed slab (only the useful widths are copied).
    ae_z = out[:, :E]
    ae_x_bar = out[:, E:E + F]
    enc_h1 = out[:, E + F:E + F + H]
    return ae_z, ae_x_bar, enc_h1


def init_params(key, num_features, hidden_size, embedding_size):
    """Deterministic init mimicking PyTorch Linear (uniform(-1/sqrt(in), 1/sqrt(in))).
    Weights are stored transposed: [in, out]."""
    ks = jax.random.split(key, 8)

    def linear(kw, kb, fan_in, fan_out):
        bound = 1.0 / jnp.sqrt(fan_in)
        w = jax.random.uniform(kw, (fan_in, fan_out), jnp.float32, -bound, bound)
        b = jax.random.uniform(kb, (fan_out,), jnp.float32, -bound, bound)
        return w, b

    w1, b1 = linear(ks[0], ks[1], num_features, hidden_size)
    w2, b2 = linear(ks[2], ks[3], hidden_size, embedding_size)
    w3, b3 = linear(ks[4], ks[5], embedding_size, hidden_size)
    w4, b4 = linear(ks[6], ks[7], hidden_size, num_features)
    return dict(w1=w1, b1=b1, w2=w2, b2=b2, w3=w3, b3=b3, w4=w4, b4=b4)


def ae_forward_ref_f32(x, params, *, alpha=0.2):
    """Pure-JAX f32 reference."""
    h1 = _leaky_relu(x @ params["w1"] + params["b1"], alpha)
    z = h1 @ params["w2"] + params["b2"]
    d1 = _leaky_relu(z @ params["w3"] + params["b3"], alpha)
    xbar = d1 @ params["w4"] + params["b4"]
    return z, xbar, h1


def ae_forward_ref_bf16(x, params, *, alpha=0.2):
    """Pure-JAX reference matching the kernel's bf16-operand / f32-acc numerics."""
    bf = jnp.bfloat16
    dot = lambda a, b: jnp.dot(a.astype(bf), b.astype(bf),
                               preferred_element_type=jnp.float32)
    h1 = _leaky_relu(dot(x, params["w1"]) + params["b1"], alpha)
    z = dot(h1, params["w2"]) + params["b2"]
    d1 = _leaky_relu(dot(z, params["w3"]) + params["b3"], alpha)
    xbar = dot(d1, params["w4"]) + params["b4"]
    return z, xbar, h1


if __name__ == "__main__":
    key = jax.random.PRNGKey(0)
    k_param, k_x = jax.random.split(key)

    batch = 8
    num_features = 32
    hidden_size = 64
    embedding_size = 16
    alpha = 0.2

    params = init_params(k_param, num_features, hidden_size, embedding_size)
    x = jax.random.normal(k_x, (batch, num_features), jnp.float32)

    z, xbar, h1 = ae_forward(x, params, alpha=alpha)
    jax.block_until_ready((z, xbar, h1))

    assert z.shape == (batch, embedding_size)
    assert xbar.shape == (batch, num_features)
    assert h1.shape == (batch, hidden_size)

    # Tight check against a reference with matching bf16-operand numerics.
    z_r, xbar_r, h1_r = ae_forward_ref_bf16(x, params, alpha=alpha)
    assert jnp.allclose(z, z_r, atol=3e-3, rtol=3e-3)
    assert jnp.allclose(xbar, xbar_r, atol=3e-3, rtol=3e-3)
    assert jnp.allclose(h1, h1_r, atol=3e-3, rtol=3e-3)

    # Loose sanity check against the full-f32 reference (bf16 MXU operands).
    z_f, xbar_f, h1_f = ae_forward_ref_f32(x, params, alpha=alpha)
    assert jnp.allclose(z, z_f, atol=5e-2, rtol=5e-2)
    assert jnp.allclose(xbar, xbar_f, atol=5e-2, rtol=5e-2)
    assert jnp.allclose(h1, h1_f, atol=5e-2, rtol=5e-2)

    print("KERNEL_OK")
</pallas_src>

<mosaic_0001>
module attributes {stable_mosaic.version = 11 : i64} {
  func.func @ae_kernel(%arg0: i32, %arg1: memref<8x32xf32, #tpu.memory_space<vmem>>, %arg2: memref<32x64xbf16, #tpu.memory_space<vmem>>, %arg3: memref<1x64xf32, #tpu.memory_space<vmem>>, %arg4: memref<64x16xbf16, #tpu.memory_space<vmem>>, %arg5: memref<1x16xf32, #tpu.memory_space<vmem>>, %arg6: memref<16x64xbf16, #tpu.memory_space<vmem>>, %arg7: memref<1x64xf32, #tpu.memory_space<vmem>>, %arg8: memref<64x32xbf16, #tpu.memory_space<vmem>>, %arg9: memref<1x32xf32, #tpu.memory_space<vmem>>, %arg10: memref<8x128xf32, #tpu.memory_space<vmem>>) attributes {dimension_semantics = [#tpu.dimension_semantics<parallel>], iteration_bounds = array<i64: 1>, scalar_prefetch = 0 : i64, scratch_operands = 0 : i64, tpu.core_type = #tpu.core_type<tc>, window_params = [{transform_indices = @transform_0, window_bounds = array<i64: 8, 32>}, {pipeline_mode = #tpu.pipeline_mode<synchronous>, transform_indices = @transform_1, window_bounds = array<i64: 32, 64>}, {pipeline_mode = #tpu.pipeline_mode<synchronous>, transform_indices = @transform_2, window_bounds = array<i64: 1, 64>}, {pipeline_mode = #tpu.pipeline_mode<synchronous>, transform_indices = @transform_3, window_bounds = array<i64: 64, 16>}, {pipeline_mode = #tpu.pipeline_mode<synchronous>, transform_indices = @transform_4, window_bounds = array<i64: 1, 16>}, {pipeline_mode = #tpu.pipeline_mode<synchronous>, transform_indices = @transform_5, window_bounds = array<i64: 16, 64>}, {pipeline_mode = #tpu.pipeline_mode<synchronous>, transform_indices = @transform_6, window_bounds = array<i64: 1, 64>}, {pipeline_mode = #tpu.pipeline_mode<synchronous>, transform_indices = @transform_7, window_bounds = array<i64: 64, 32>}, {pipeline_mode = #tpu.pipeline_mode<synchronous>, transform_indices = @transform_8, window_bounds = array<i64: 1, 32>}, {transform_indices = @transform_9, window_bounds = array<i64: 8, 128>}]} {
    %c0 = arith.constant 0 : index
    %c0_0 = arith.constant 0 : index
    %0 = vector.load %arg1[%c0, %c0_0] : memref<8x32xf32, #tpu.memory_space<vmem>>, vector<8x32xf32>
    %1 = arith.truncf %0 : vector<8x32xf32> to vector<8x32xbf16>
    %c0_1 = arith.constant 0 : index
    %c0_2 = arith.constant 0 : index
    %2 = vector.load %arg2[%c0_1, %c0_2] : memref<32x64xbf16, #tpu.memory_space<vmem>>, vector<32x64xbf16>
    %cst = arith.constant dense<0.000000e+00> : vector<8x64xf32>
    %3 = tpu.matmul %1, %2, %cst {dimension_numbers = #tpu.dot_dimension_numbers<[1], [0], [0], [1], [0, 0, 1, 1], [], []>} : vector<8x32xbf16>, vector<32x64xbf16>, vector<8x64xf32> -> vector<8x64xf32>
    %c0_3 = arith.constant 0 : index
    %c0_4 = arith.constant 0 : index
    %4 = vector.load %arg3[%c0_3, %c0_4] : memref<1x64xf32, #tpu.memory_space<vmem>>, vector<1x64xf32>
    %5 = vector.broadcast %4 : vector<1x64xf32> to vector<8x64xf32>
    %6 = arith.addf %3, %5 : vector<8x64xf32>
    %cst_5 = arith.constant 0.000000e+00 : f32
    %7 = vector.broadcast %cst_5 : f32 to vector<8x64xf32>
    %8 = arith.cmpf ogt, %6, %7 : vector<8x64xf32>
    %cst_6 = arith.constant 2.000000e-01 : f32
    %9 = vector.broadcast %cst_6 : f32 to vector<8x64xf32>
    %10 = arith.mulf %9, %6 : vector<8x64xf32>
    %11 = arith.select %8, %6, %10 : vector<8x64xi1>, vector<8x64xf32>
    %12 = arith.truncf %11 : vector<8x64xf32> to vector<8x64xbf16>
    %c0_7 = arith.constant 0 : index
    %c0_8 = arith.constant 0 : index
    %13 = vector.load %arg4[%c0_7, %c0_8] : memref<64x16xbf16, #tpu.memory_space<vmem>>, vector<64x16xbf16>
    %cst_9 = arith.constant dense<0.000000e+00> : vector<8x16xf32>
    %14 = tpu.matmul %12, %13, %cst_9 {dimension_numbers = #tpu.dot_dimension_numbers<[1], [0], [0], [1], [0, 0, 1, 1], [], []>} : vector<8x64xbf16>, vector<64x16xbf16>, vector<8x16xf32> -> vector<8x16xf32>
    %c0_10 = arith.constant 0 : index
    %c0_11 = arith.constant 0 : index
    %15 = vector.load %arg5[%c0_10, %c0_11] : memref<1x16xf32, #tpu.memory_space<vmem>>, vector<1x16xf32>
    %16 = vector.broadcast %15 : vector<1x16xf32> to vector<8x16xf32>
    %17 = arith.addf %14, %16 : vector<8x16xf32>
    %18 = arith.truncf %17 : vector<8x16xf32> to vector<8x16xbf16>
    %c0_12 = arith.constant 0 : index
    %c0_13 = arith.constant 0 : index
    %19 = vector.load %arg6[%c0_12, %c0_13] : memref<16x64xbf16, #tpu.memory_space<vmem>>, vector<16x64xbf16>
    %cst_14 = arith.constant dense<0.000000e+00> : vector<8x64xf32>
    %20 = tpu.matmul %18, %19, %cst_14 {dimension_numbers = #tpu.dot_dimension_numbers<[1], [0], [0], [1], [0, 0, 1, 1], [], []>} : vector<8x16xbf16>, vector<16x64xbf16>, vector<8x64xf32> -> vector<8x64xf32>
    %c0_15 = arith.constant 0 : index
    %c0_16 = arith.constant 0 : index
    %21 = vector.load %arg7[%c0_15, %c0_16] : memref<1x64xf32, #tpu.memory_space<vmem>>, vector<1x64xf32>
    %22 = vector.broadcast %21 : vector<1x64xf32> to vector<8x64xf32>
    %23 = arith.addf %20, %22 : vector<8x64xf32>
    %cst_17 = arith.constant 0.000000e+00 : f32
    %24 = vector.broadcast %cst_17 : f32 to vector<8x64xf32>
    %25 = arith.cmpf ogt, %23, %24 : vector<8x64xf32>
    %cst_18 = arith.constant 2.000000e-01 : f32
    %26 = vector.broadcast %cst_18 : f32 to vector<8x64xf32>
    %27 = arith.mulf %26, %23 : vector<8x64xf32>
    %28 = arith.select %25, %23, %27 : vector<8x64xi1>, vector<8x64xf32>
    %29 = arith.truncf %28 : vector<8x64xf32> to vector<8x64xbf16>
    %c0_19 = arith.constant 0 : index
    %c0_20 = arith.constant 0 : index
    %30 = vector.load %arg8[%c0_19, %c0_20] : memref<64x32xbf16, #tpu.memory_space<vmem>>, vector<64x32xbf16>
    %cst_21 = arith.constant dense<0.000000e+00> : vector<8x32xf32>
    %31 = tpu.matmul %29, %30, %cst_21 {dimension_numbers = #tpu.dot_dimension_numbers<[1], [0], [0], [1], [0, 0, 1, 1], [], []>} : vector<8x64xbf16>, vector<64x32xbf16>, vector<8x32xf32> -> vector<8x32xf32>
    %c0_22 = arith.constant 0 : index
    %c0_23 = arith.constant 0 : index
    %32 = vector.load %arg9[%c0_22, %c0_23] : memref<1x32xf32, #tpu.memory_space<vmem>>, vector<1x32xf32>
    %33 = vector.broadcast %32 : vector<1x32xf32> to vector<8x32xf32>
    %34 = arith.addf %31, %33 : vector<8x32xf32>
    %cst_24 = arith.constant 0.000000e+00 : f32
    %35 = vector.broadcast %cst_24 : f32 to vector<8x16xf32>
    %36 = tpu.concatenate %17, %34, %11, %35 in 1 : vector<8x16xf32>, vector<8x32xf32>, vector<8x64xf32>, vector<8x16xf32> -> vector<8x128xf32>
    %c0_25 = arith.constant 0 : index
    %c0_26 = arith.constant 0 : index
    %37 = vector.load %arg10[%c0_25, %c0_26] : memref<8x128xf32, #tpu.memory_space<vmem>>, vector<8x128xf32>
    tpu.vector_store %arg10[%c0_25, %c0_26], %36 {strides = array<i32>} : memref<8x128xf32, #tpu.memory_space<vmem>>, vector<8x128xf32>,
    return
  }
  func.func @transform_0(%arg0: i32) -> (i32, i32) {
    %c0_i32 = arith.constant 0 : i32
    %c0_i32_0 = arith.constant 0 : i32
    return %arg0, %c0_i32 : i32, i32
  }
  func.func @transform_1(%arg0: i32) -> (i32, i32) {
    %c0_i32 = arith.constant 0 : i32
    %c0_i32_0 = arith.constant 0 : i32
    %c0_i32_1 = arith.constant 0 : i32
    return %c0_i32, %c0_i32_0 : i32, i32
  }
  func.func @transform_2(%arg0: i32) -> (i32, i32) {
    %c0_i32 = arith.constant 0 : i32
    %c0_i32_0 = arith.constant 0 : i32
    %c0_i32_1 = arith.constant 0 : i32
    return %c0_i32, %c0_i32_0 : i32, i32
  }
  func.func @transform_3(%arg0: i32) -> (i32, i32) {
    %c0_i32 = arith.constant 0 : i32
    %c0_i32_0 = arith.constant 0 : i32
    %c0_i32_1 = arith.constant 0 : i32
    return %c0_i32, %c0_i32_0 : i32, i32
  }
  func.func @transform_4(%arg0: i32) -> (i32, i32) {
    %c0_i32 = arith.constant 0 : i32
    %c0_i32_0 = arith.constant 0 : i32
    %c0_i32_1 = arith.constant 0 : i32
    return %c0_i32, %c0_i32_0 : i32, i32
  }
  func.func @transform_5(%arg0: i32) -> (i32, i32) {
    %c0_i32 = arith.constant 0 : i32
    %c0_i32_0 = arith.constant 0 : i32
    %c0_i32_1 = arith.constant 0 : i32
    return %c0_i32, %c0_i32_0 : i32, i32
  }
  func.func @transform_6(%arg0: i32) -> (i32, i32) {
    %c0_i32 = arith.constant 0 : i32
    %c0_i32_0 = arith.constant 0 : i32
    %c0_i32_1 = arith.constant 0 : i32
    return %c0_i32, %c0_i32_0 : i32, i32
  }
  func.func @transform_7(%arg0: i32) -> (i32, i32) {
    %c0_i32 = arith.constant 0 : i32
    %c0_i32_0 = arith.constant 0 : i32
    %c0_i32_1 = arith.constant 0 : i32
    return %c0_i32, %c0_i32_0 : i32, i32
  }
  func.func @transform_8(%arg0: i32) -> (i32, i32) {
    %c0_i32 = arith.constant 0 : i32
    %c0_i32_0 = arith.constant 0 : i32
    %c0_i32_1 = arith.constant 0 : i32
    return %c0_i32, %c0_i32_0 : i32, i32
  }
  func.func @transform_9(%arg0: i32) -> (i32, i32) {
    %c0_i32 = arith.constant 0 : i32
    %c0_i32_0 = arith.constant 0 : i32
    return %arg0, %c0_i32 : i32, i32
  }
}

</mosaic_0001>

<bundles_post_ra>
// kernel: tpu_custom_call.1
= control target key start
LH: loop header
LB: loop body
LE: loop exit
PB: predicated region body
PF: predicated region fallthrough
CT: control target
= control target key end

     0   :  { %v474_v1 = vmov 0.0   ;;  %vm475_vm0 = vmmov 0   ;;  %vm59_vm1 = vcmask 261120   ;;  %s588_s0 = inlined_call_operand.vmem [shape: f32[8,32], index: 0, kind: input, shape index: {}]   ;;  %s589_s1 = inlined_call_operand.vmem [shape: bf16[32,64], index: 1, kind: input, shape index: {}]   ;;  %s590_s2 = inlined_call_operand.vmem [shape: f32[1,64], index: 2, kind: input, shape index: {}]   ;;  %s591_s3 = inlined_call_operand.vmem [shape: bf16[64,16], index: 3, kind: input, shape index: {}]   ;;  %s592_s4 = inlined_call_operand.vmem [shape: f32[1,16], index: 4, kind: input, shape index: {}]   ;;  %s593_s5 = inlined_call_operand.vmem [shape: bf16[16,64], index: 5, kind: input, shape index: {}]   ;;  %s594_s6 = inlined_call_operand.vmem [shape: f32[1,64], index: 6, kind: input, shape index: {}]   ;;  %s595_s7 = inlined_call_operand.vmem [shape: bf16[64,32], index: 7, kind: input, shape index: {}]   ;;  %s596_s8 = inlined_call_operand.vmem [shape: f32[1,32], index: 8, kind: input, shape index: {}]   ;;  %s597_s9 = inlined_call_operand.hbm [shape: f32[8,128], index: 9, kind: output, shape index: {}]  }
   0x1   :  { %v441_v0 = vld [vmem:[%s589_s1 + $0x8] sm:$0xff]   ;;  %398 = vmatprep.subr.bf16.mxu1 %v474_v1  ;;  %v442_v2 = vld [vmem:[%s589_s1] sm:$0xff]   ;;  %418 = vmatprep.subr.bf16.mxu0 %v474_v1  ;;  %v443_v4 = vld [vmem:[%s591_s3 + $0x18] sm:$0xff]  }
   0x2   :  { %399 = vmatpush3.bf16.msra.mxu1 %v441_v0  ;;  %402 = vmatprep.mubr.msk.bf16.mxu1 %vm475_vm0, %v474_v1  ;;  %v34_v3 = vld [vmem:[%s588_s0] sm:$0xff] }
   0x3   :  { %400 = vmatprep.subr.bf16.mxu1 %v474_v1  ;;  %420 = vmatprep.mubr.msk.bf16.mxu0 %vm475_vm0, %v474_v1  ;;  %v35_v5 = vpack.c.bf16 %v34_v3, %v34_v3 }
   0x6   :  { %401 = vmatpush3.bf16.msra.mxu1 %v442_v2 }
   0x7   :  { %406 = vmatprep.subr.bf16.mxu1 %v474_v1 }
   0x9   :  { %403 = vmatmul.mubr.msk.bf16.vlgmr.msra.gmra.mxu1 %vm59_vm1, %v35_v5 }
   0xa   :  { %14 = vsyncpa [#allocation3], 0  ;;  %407 = vmatpush3.bf16.msra.mxu1 %v443_v4  ;;  %v444_v6 = vld [vmem:[%s591_s3 + $0x10] sm:$0xff]   ;;  %414 = vmatprep.mubr.msk.bf16.mxu1 %vm475_vm0, %v474_v1  ;;  %v445_v7 = vld [vmem:[%s591_s3 + $0x8] sm:$0xff]   ;;  %vm146_vm3 = vcmask 523264   ;;  %vm206_vm4 = vcmask 130048  }
   0xb   :  { %408 = vmatprep.subr.bf16.mxu1 %v474_v1  ;;  %v446_v8 = vld [vmem:[%s591_s3] sm:$0xff]   ;;  %v448_v23 = vld [vmem:[%s595_s7 + $0x18] sm:$0xff]   ;;  %v449_v27 = vld [vmem:[%s595_s7 + $0x10] sm:$0xff]   ;;  %vm345_vm6 = vcmask 392192   ;;  %s478_s14 = smov [#allocation2]   ;;  %vm347_vm7 = vcmask 916480  }
   0xc   :  { %v364_v9 = vld [vmem:[%s590_s2] ss:$0 sm:$0xff]  ;;  %v450_v28 = vld [vmem:[%s595_s7 + $0x8] sm:$0xff]   ;;  %s356_s15 = sshll.u32 %s478_s14, 4  ;;  %s357_s15 = int_to_ptr.vmem [resolvable:$true] %s356_s15 }
   0xd   :  { %v447_v18 = vld [vmem:[%s593_s5] sm:$0xff]   ;;  %p457_p1 = scmp.lt.s32.totalorder %s357_s15, %s357_s15 }
   0xe   :  { %409 = vmatpush3.bf16.msra.mxu1 %v444_v6  ;;  %419 = vmatpush3.bf16.msra.mxu0 %v447_v18  ;;  %v368_v19 = vld [vmem:[%s592_s4] ss:$0 sm:$0xff] }
   0xf   :  { %410 = vmatprep.subr.bf16.mxu1 %v474_v1  ;;  %424 = vmatprep.subr.bf16.mxu0 %v474_v1  ;;  %v451_v29 = vld [vmem:[%s595_s7] sm:$0xff]   ;;  %s476_s7 = smov 16  }
  0x10   :  { %v374_v30 = vld [vmem:[%s594_s6] ss:$0 sm:$0xff]  ;;  %s477_s6 = smov 48  }
  0x11   :  { %v377_v39 = vld [vmem:[%s596_s8] ss:$0 sm:$0xff]  ;;  %s452_s8 = scalar_lea.vmem %s357_s15, 128 }
  0x12   :  { %411 = vmatpush3.bf16.msra.mxu1 %v445_v7  ;;  %p453_p0 = scmp.ne.s32.totalorder %s357_s15, %s452_s8  ;;  %p458_p2 = scmp.lt.s32.totalorder %s452_s8, %s452_s8 }
  0x13   :  { %412 = vmatprep.subr.bf16.mxu1 %v474_v1 }
  0x14   :  { %p459_p3 = por %p458_p2, %p457_p1 }
  0x16   :  { %413 = vmatpush3.bf16.msra.mxu1 %v446_v8  ;;  %p460_p4 = pnand %p459_p3, %p453_p0 }
  0xc9   :  { %v97_v10 = vpop.f32.mrf.mxu1 }
  0xca   :  { %v98_v11 = vadd.f32 %v364_v9, %v97_v10 }
  0xcb   :  { %v404_v12 = vpop.f32.mrf.mxu1 }
  0xcc   :  { %vm103_vm2 = vcmp.gt.f32.partialorder %v98_v11, 0.0  ;;  %v104_v13 = vmul.f32 0.2, %v98_v11 }
  0xcd   :  { %v100_v14 = vpop.f32.mrf.mxu1 }
  0xce   :  { %v105_v15 = vsel %vm103_vm2, %v98_v11, %v104_v13 }
  0xcf   :  { %v106_v16 = vpack.c.bf16 %v105_v15, %v105_v15  ;;  %v405_v17 = vpop.f32.mrf.mxu1 }
  0xd1   :  { %415 = vmatmul.mubr.msk.bf16.vlgmr.msra.gmra.mxu1 %vm146_vm3, %v106_v16 }
 0x191   :  { %v184_v20 = vpop.f32.mrf.mxu1 }
 0x192   :  { %v185_v21 = vadd.f32 %v368_v19, %v184_v20 }
 0x193   :  { %v416_v22 = vpop.f32.mrf.mxu1 }
 0x194   :  { %v190_v24 = vpack.c.bf16 %v185_v21, %v185_v21 }
 0x195   :  { %v187_v25 = vpop.f32.mrf.mxu1 }
 0x196   :  { %421 = vmatmul.mubr.msk.bf16.vlgmr.msra.gmra.mxu0 %vm206_vm4, %v190_v24 }
 0x197   :  { %v417_v26 = vpop.f32.mrf.mxu1  ;;  %425 = vmatpush3.bf16.msra.mxu0 %v448_v23  ;;  %432 = vmatprep.mubr.msk.bf16.mxu0 %vm475_vm0, %v474_v1 }
 0x198   :  { %426 = vmatprep.subr.bf16.mxu0 %v474_v1 }
 0x19b   :  { %427 = vmatpush3.bf16.msra.mxu0 %v449_v27 }
 0x19c   :  { %428 = vmatprep.subr.bf16.mxu0 %v474_v1 }
 0x19f   :  { %429 = vmatpush3.bf16.msra.mxu0 %v450_v28 }
 0x1a0   :  { %430 = vmatprep.subr.bf16.mxu0 %v474_v1 }
 0x1a3   :  { %431 = vmatpush3.bf16.msra.mxu0 %v451_v29 }
 0x256   :  { %v244_v31 = vpop.f32.mrf.mxu0 }
 0x257   :  { %v245_v32 = vadd.f32 %v374_v30, %v244_v31 }
 0x258   :  { %v422_v33 = vpop.f32.mrf.mxu0 }
 0x259   :  { %vm250_vm5 = vcmp.gt.f32.partialorder %v245_v32, 0.0  ;;  %v251_v34 = vmul.f32 0.2, %v245_v32 }
 0x25a   :  { %v247_v35 = vpop.f32.mrf.mxu0 }
 0x25b   :  { %v252_v36 = vsel %vm250_vm5, %v245_v32, %v251_v34 }
 0x25c   :  { %v253_v37 = vpack.c.bf16 %v252_v36, %v252_v36  ;;  %v423_v38 = vpop.f32.mrf.mxu0 }
 0x25e   :  { %433 = vmatmul.mubr.msk.bf16.vlgmr.msra.gmra.mxu0 %vm146_vm3, %v253_v37 }
 0x31e   :  { %v330_v40 = vpop.f32.mrf.mxu0 }
 0x31f   :  { %v331_v41 = vadd.f32 %v377_v39, %v330_v40 }
 0x320   :  { %v434_v42 = vpop.f32.mrf.mxu0 }
 0x321   :  { %337 = vrot.lane.b32.xlu0 %v331_v41, %s476_s7 }
 0x322   :  { %v333_v43 = vpop.f32.mrf.mxu0 }
 0x324   :  { %v435_v44 = vpop.f32.mrf.mxu0 }
 0x325   :  { %341 = vrot.lane.b32.xlu0 %v105_v15, %s477_s6 }
 0x393   :  { %v338_v45 = vpop.permute.xlu0 %337 }
 0x394   :  { %v344_v46 = vsel %vm206_vm4, %v185_v21, %v338_v45 }
 0x397   :  { %v342_v47 = vpop.permute.xlu0 %341 }
 0x398   :  { %v346_v48 = vsel %vm345_vm6, %v344_v46, %v342_v47 }
 0x399   :  { %v348_v49 = vsel %vm347_vm7, %v346_v48, 0.0 }
 0x39a   :  { %349 = vst [vmem:[#allocation2] sm:$0xff] %v348_v49 }
 0x39b   :  { %463 = shalt.err (!%p460_p4)
}
 0x39c   :  { %359 = dma.vmem_to_hbm [thread:$0]  %s357_s15, 128, %s597_s9, [#allocation3]  }
 0x39d   :  { %472 = dma.done.wait [#allocation3], 128  }
 0x39e   :  { %473 = vsyncadd [#allocation3], 4294967168 }
 0x39f   :  { %363 = vsyncpa [#allocation3], 1 }

</bundles_post_ra>
